<compile_context>
chip_gen: v7x
topology: tpu7x:2x2x1
jax: 0.10.0
libtpu: 0.0.40
codegen_flags: <defaults>
</compile_context>

<pallas_src>
import jax
import jax.numpy as jnp
from jax.experimental import pallas as pl
from jax.experimental.pallas import tpu as pltpu

LOG_STD_MIN = -20.0
LOG_STD_MAX = 2.0


def _round_up(x, m):
    return ((x + m - 1) // m) * m


def actor_kernel(x_ref, w1_ref, b1_ref, w2_ref, b2_ref, w3_ref, b3_ref, out_ref):
    # Activations cast to bf16 for the native bf16 x bf16 -> f32 MXU path;
    # accumulation, bias, ReLU and clip stay in f32.
    x = x_ref[...].astype(jnp.bfloat16)

    h1 = jnp.dot(x, w1_ref[...], preferred_element_type=jnp.float32) + b1_ref[...]
    h1 = jnp.maximum(h1, 0.0)

    h2 = jnp.dot(h1.astype(jnp.bfloat16), w2_ref[...],
                 preferred_element_type=jnp.float32) + b2_ref[...]
    h2 = jnp.maximum(h2, 0.0)

    out = jnp.dot(h2.astype(jnp.bfloat16), w3_ref[...],
                  preferred_element_type=jnp.float32) + b3_ref[...]

    a_pad = out.shape[-1]
    # Lane-dense fused output slab: [mean | clamped log_std], both 128-aligned.
    out_ref[:, :a_pad] = out
    out_ref[:, a_pad:] = jnp.clip(out, LOG_STD_MIN, LOG_STD_MAX)


def actor_forward(state, params, *, max_batch_tile=256):
    """Run the Actor forward pass in one Pallas kernel.

    state:  f32[B, state_space]
    params: dict from init_actor_params (padded, bf16 weights / f32 biases)
    returns (mean, log_std), each f32[B, action_space]
    """
    B, S = state.shape
    w1, b1 = params["w1"], params["b1"]
    w2, b2 = params["w2"], params["b2"]
    w3, b3 = params["w3"], params["b3"]
    A = params["action_space"]

    S_pad, H1 = w1.shape
    _, H2 = w2.shape
    _, A_pad = w3.shape

    # Batch tile: multiple of 8 sublanes, capped at max_batch_tile.
    tb = min(_round_up(max(B, 1), 8), max_batch_tile)
    B_pad = _round_up(B, tb)
    n_b = B_pad // tb

    x = jnp.pad(state.astype(jnp.float32), ((0, B_pad - B), (0, S_pad - S)))

    flops = 2 * B_pad * (S_pad * H1 + H1 * H2 + H2 * A_pad)
    bytes_accessed = (
        x.size * x.dtype.itemsize
        + sum(a.size * a.dtype.itemsize for a in (w1, b1, w2, b2, w3, b3))
        + B_pad * 2 * A_pad * 4
    )

    slab = pl.pallas_call(
        actor_kernel,
        out_shape=jax.ShapeDtypeStruct((B_pad, 2 * A_pad), jnp.float32),
        grid_spec=pltpu.PrefetchScalarGridSpec(
            num_scalar_prefetch=0,
            grid=(n_b,),
            in_specs=[
                pl.BlockSpec((tb, S_pad), lambda i: (i, 0)),   # state tile
                pl.BlockSpec((S_pad, H1), lambda i: (0, 0)),   # w1 (resident)
                pl.BlockSpec((1, H1), lambda i: (0, 0)),       # b1
                pl.BlockSpec((H1, H2), lambda i: (0, 0)),      # w2 (resident)
                pl.BlockSpec((1, H2), lambda i: (0, 0)),       # b2
                pl.BlockSpec((H2, A_pad), lambda i: (0, 0)),   # w3 (resident)
                pl.BlockSpec((1, A_pad), lambda i: (0, 0)),    # b3
            ],
            out_specs=pl.BlockSpec((tb, 2 * A_pad), lambda i: (i, 0)),
        ),
        compiler_params=pltpu.CompilerParams(
            dimension_semantics=("parallel",)),
        cost_estimate=pl.CostEstimate(
            flops=flops, transcendentals=0, bytes_accessed=bytes_accessed),
    )(x, w1, b1, w2, b2, w3, b3)

    mean = slab[:B, :A]
    log_std = slab[:B, A_pad:A_pad + A]
    return mean, log_std


def init_actor_params(key, state_space, action_space, weights_dtype=jnp.bfloat16):
    """PyTorch-Linear-style init (uniform +/- 1/sqrt(fan_in)) on the real dims,
    then zero-pad to lane-aligned shapes and cast weights to bf16.

    Returns (kernel_params, ref_params_f32_unpadded)."""
    S_pad = _round_up(state_space, 128)
    H1_pad, H2_pad = 128, 512                       # 100 -> 128, 500 -> 512
    A_pad = _round_up(action_space, 128)

    def linear(k, fan_in, fan_out, pad_in, pad_out):
        kw, kb = jax.random.split(k)
        bound = 1.0 / (fan_in ** 0.5)
        w = jax.random.uniform(kw, (fan_in, fan_out), jnp.float32, -bound, bound)
        b = jax.random.uniform(kb, (1, fan_out), jnp.float32, -bound, bound)
        w_pad = jnp.zeros((pad_in, pad_out), jnp.float32).at[:fan_in, :fan_out].set(w)
        b_pad = jnp.zeros((1, pad_out), jnp.float32).at[:, :fan_out].set(b)
        return w, b, w_pad.astype(weights_dtype), b_pad

    k1, k2, k3 = jax.random.split(key, 3)
    w1, b1, w1p, b1p = linear(k1, state_space, 100, S_pad, H1_pad)
    w2, b2, w2p, b2p = linear(k2, 100, 500, H1_pad, H2_pad)
    w3, b3, w3p, b3p = linear(k3, 500, action_space, H2_pad, A_pad)

    kernel_params = {"w1": w1p, "b1": b1p, "w2": w2p, "b2": b2p,
                     "w3": w3p, "b3": b3p, "action_space": action_space}
    ref_params = {"w1": w1, "b1": b1, "w2": w2, "b2": b2, "w3": w3, "b3": b3}
    return kernel_params, ref_params


if __name__ == "__main__":
    key = jax.random.PRNGKey(0)
    k_params, k_state = jax.random.split(key)

    batch = 2
    state_space = 32
    action_space = 8

    params, ref_params = init_actor_params(k_params, state_space, action_space)
    state = jax.random.normal(k_state, (batch, state_space), jnp.float32)

    mean, log_std = actor_forward(state, params)
    jax.block_until_ready((mean, log_std))

    assert mean.shape == (batch, action_space)
    assert log_std.shape == (batch, action_space)

    # (1) Reference that mirrors the kernel arithmetic exactly
    #     (padded bf16 weights, bf16 activations into f32-accumulating dots).
    S_pad = params["w1"].shape[0]
    A_pad = params["w3"].shape[1]
    x_pad = jnp.pad(state, ((0, 0), (0, S_pad - state_space)))
    xb = x_pad.astype(jnp.bfloat16)
    h1 = jnp.maximum(
        jnp.dot(xb, params["w1"], preferred_element_type=jnp.float32) + params["b1"], 0.0)
    h2 = jnp.maximum(
        jnp.dot(h1.astype(jnp.bfloat16), params["w2"],
                preferred_element_type=jnp.float32) + params["b2"], 0.0)
    out = jnp.dot(h2.astype(jnp.bfloat16), params["w3"],
                  preferred_element_type=jnp.float32) + params["b3"]
    ref_mean = out[:, :action_space]
    ref_log_std = jnp.clip(out, LOG_STD_MIN, LOG_STD_MAX)[:, :action_space]
    assert jnp.allclose(mean, ref_mean, atol=1e-4, rtol=1e-4)
    assert jnp.allclose(log_std, ref_log_std, atol=1e-4, rtol=1e-4)

    # (2) Sanity check vs. the original full-f32, unpadded module semantics
    #     (loose tolerance accounts only for the bf16 weight/activation cast).
    h1f = jnp.maximum(state @ ref_params["w1"] + ref_params["b1"], 0.0)
    h2f = jnp.maximum(h1f @ ref_params["w2"] + ref_params["b2"], 0.0)
    outf = h2f @ ref_params["w3"] + ref_params["b3"]
    assert jnp.allclose(mean, outf, atol=5e-2, rtol=5e-2)
    assert jnp.allclose(log_std, jnp.clip(outf, LOG_STD_MIN, LOG_STD_MAX),
                        atol=5e-2, rtol=5e-2)

    # TODO(synk): Actor.sample (Normal rsample / tanh log-prob / entropy) is not
    # part of forward(); it stays in plain JAX outside the kernel.
    print("KERNEL_OK")
</pallas_src>

<mosaic_0001>
module attributes {stable_mosaic.version = 11 : i64} {
  func.func @actor_kernel(%arg0: i32, %arg1: memref<8x128xf32, #tpu.memory_space<vmem>>, %arg2: memref<128x128xbf16, #tpu.memory_space<vmem>>, %arg3: memref<1x128xf32, #tpu.memory_space<vmem>>, %arg4: memref<128x512xbf16, #tpu.memory_space<vmem>>, %arg5: memref<1x512xf32, #tpu.memory_space<vmem>>, %arg6: memref<512x128xbf16, #tpu.memory_space<vmem>>, %arg7: memref<1x128xf32, #tpu.memory_space<vmem>>, %arg8: memref<8x256xf32, #tpu.memory_space<vmem>>) attributes {dimension_semantics = [#tpu.dimension_semantics<parallel>], iteration_bounds = array<i64: 1>, scalar_prefetch = 0 : i64, scratch_operands = 0 : i64, tpu.core_type = #tpu.core_type<tc>, window_params = [{transform_indices = @transform_0, window_bounds = array<i64: 8, 128>}, {pipeline_mode = #tpu.pipeline_mode<synchronous>, transform_indices = @transform_1, window_bounds = array<i64: 128, 128>}, {pipeline_mode = #tpu.pipeline_mode<synchronous>, transform_indices = @transform_2, window_bounds = array<i64: 1, 128>}, {pipeline_mode = #tpu.pipeline_mode<synchronous>, transform_indices = @transform_3, window_bounds = array<i64: 128, 512>}, {pipeline_mode = #tpu.pipeline_mode<synchronous>, transform_indices = @transform_4, window_bounds = array<i64: 1, 512>}, {pipeline_mode = #tpu.pipeline_mode<synchronous>, transform_indices = @transform_5, window_bounds = array<i64: 512, 128>}, {pipeline_mode = #tpu.pipeline_mode<synchronous>, transform_indices = @transform_6, window_bounds = array<i64: 1, 128>}, {transform_indices = @transform_7, window_bounds = array<i64: 8, 256>}]} {
    %c0 = arith.constant 0 : index
    %c0_0 = arith.constant 0 : index
    %0 = vector.load %arg1[%c0, %c0_0] : memref<8x128xf32, #tpu.memory_space<vmem>>, vector<8x128xf32>
    %1 = arith.truncf %0 : vector<8x128xf32> to vector<8x128xbf16>
    %c0_1 = arith.constant 0 : index
    %c0_2 = arith.constant 0 : index
    %2 = vector.load %arg2[%c0_1, %c0_2] : memref<128x128xbf16, #tpu.memory_space<vmem>>, vector<128x128xbf16>
    %cst = arith.constant dense<0.000000e+00> : vector<8x128xf32>
    %3 = tpu.matmul %1, %2, %cst {dimension_numbers = #tpu.dot_dimension_numbers<[1], [0], [0], [1], [0, 0, 1, 1], [], []>} : vector<8x128xbf16>, vector<128x128xbf16>, vector<8x128xf32> -> vector<8x128xf32>
    %c0_3 = arith.constant 0 : index
    %c0_4 = arith.constant 0 : index
    %4 = vector.load %arg3[%c0_3, %c0_4] : memref<1x128xf32, #tpu.memory_space<vmem>>, vector<1x128xf32>
    %5 = vector.broadcast %4 : vector<1x128xf32> to vector<8x128xf32>
    %6 = arith.addf %3, %5 : vector<8x128xf32>
    %cst_5 = arith.constant 0.000000e+00 : f32
    %7 = vector.broadcast %cst_5 : f32 to vector<8x128xf32>
    %8 = arith.maximumf %6, %7 : vector<8x128xf32>
    %9 = arith.truncf %8 : vector<8x128xf32> to vector<8x128xbf16>
    %c0_6 = arith.constant 0 : index
    %c0_7 = arith.constant 0 : index
    %10 = vector.load %arg4[%c0_6, %c0_7] : memref<128x512xbf16, #tpu.memory_space<vmem>>, vector<128x512xbf16>
    %cst_8 = arith.constant dense<0.000000e+00> : vector<8x512xf32>
    %11 = tpu.matmul %9, %10, %cst_8 {dimension_numbers = #tpu.dot_dimension_numbers<[1], [0], [0], [1], [0, 0, 1, 1], [], []>} : vector<8x128xbf16>, vector<128x512xbf16>, vector<8x512xf32> -> vector<8x512xf32>
    %c0_9 = arith.constant 0 : index
    %c0_10 = arith.constant 0 : index
    %12 = vector.load %arg5[%c0_9, %c0_10] : memref<1x512xf32, #tpu.memory_space<vmem>>, vector<1x512xf32>
    %13 = vector.broadcast %12 : vector<1x512xf32> to vector<8x512xf32>
    %14 = arith.addf %11, %13 : vector<8x512xf32>
    %cst_11 = arith.constant 0.000000e+00 : f32
    %15 = vector.broadcast %cst_11 : f32 to vector<8x512xf32>
    %16 = arith.maximumf %14, %15 : vector<8x512xf32>
    %17 = arith.truncf %16 : vector<8x512xf32> to vector<8x512xbf16>
    %c0_12 = arith.constant 0 : index
    %c0_13 = arith.constant 0 : index
    %18 = vector.load %arg6[%c0_12, %c0_13] : memref<512x128xbf16, #tpu.memory_space<vmem>>, vector<512x128xbf16>
    %cst_14 = arith.constant dense<0.000000e+00> : vector<8x128xf32>
    %19 = tpu.matmul %17, %18, %cst_14 {dimension_numbers = #tpu.dot_dimension_numbers<[1], [0], [0], [1], [0, 0, 1, 1], [], []>} : vector<8x512xbf16>, vector<512x128xbf16>, vector<8x128xf32> -> vector<8x128xf32>
    %c0_15 = arith.constant 0 : index
    %c0_16 = arith.constant 0 : index
    %20 = vector.load %arg7[%c0_15, %c0_16] : memref<1x128xf32, #tpu.memory_space<vmem>>, vector<1x128xf32>
    %21 = vector.broadcast %20 : vector<1x128xf32> to vector<8x128xf32>
    %22 = arith.addf %19, %21 : vector<8x128xf32>
    %c0_17 = arith.constant 0 : index
    %c0_18 = arith.constant 0 : index
    %23 = vector.load %arg8[%c0_17, %c0_18] : memref<8x256xf32, #tpu.memory_space<vmem>>, vector<8x128xf32>
    tpu.vector_store %arg8[%c0_17, %c0_18], %22 {strides = array<i32>} : memref<8x256xf32, #tpu.memory_space<vmem>>, vector<8x128xf32>,
    %cst_19 = arith.constant -2.000000e+01 : f32
    %cst_20 = arith.constant 2.000000e+00 : f32
    %24 = vector.broadcast %cst_19 : f32 to vector<8x128xf32>
    %25 = arith.maximumf %24, %22 : vector<8x128xf32>
    %26 = vector.broadcast %cst_20 : f32 to vector<8x128xf32>
    %27 = arith.minimumf %26, %25 : vector<8x128xf32>
    %c0_21 = arith.constant 0 : index
    %c128 = arith.constant 128 : index
    %28 = vector.load %arg8[%c0_21, %c128] : memref<8x256xf32, #tpu.memory_space<vmem>>, vector<8x128xf32>
    tpu.vector_store %arg8[%c0_21, %c128], %27 {strides = array<i32>} : memref<8x256xf32, #tpu.memory_space<vmem>>, vector<8x128xf32>,
    return
  }
  func.func @transform_0(%arg0: i32) -> (i32, i32) {
    %c0_i32 = arith.constant 0 : i32
    %c0_i32_0 = arith.constant 0 : i32
    return %arg0, %c0_i32 : i32, i32
  }
  func.func @transform_1(%arg0: i32) -> (i32, i32) {
    %c0_i32 = arith.constant 0 : i32
    %c0_i32_0 = arith.constant 0 : i32
    %c0_i32_1 = arith.constant 0 : i32
    return %c0_i32, %c0_i32_0 : i32, i32
  }
  func.func @transform_2(%arg0: i32) -> (i32, i32) {
    %c0_i32 = arith.constant 0 : i32
    %c0_i32_0 = arith.constant 0 : i32
    %c0_i32_1 = arith.constant 0 : i32
    return %c0_i32, %c0_i32_0 : i32, i32
  }
  func.func @transform_3(%arg0: i32) -> (i32, i32) {
    %c0_i32 = arith.constant 0 : i32
    %c0_i32_0 = arith.constant 0 : i32
    %c0_i32_1 = arith.constant 0 : i32
    return %c0_i32, %c0_i32_0 : i32, i32
  }
  func.func @transform_4(%arg0: i32) -> (i32, i32) {
    %c0_i32 = arith.constant 0 : i32
    %c0_i32_0 = arith.constant 0 : i32
    %c0_i32_1 = arith.constant 0 : i32
    return %c0_i32, %c0_i32_0 : i32, i32
  }
  func.func @transform_5(%arg0: i32) -> (i32, i32) {
    %c0_i32 = arith.constant 0 : i32
    %c0_i32_0 = arith.constant 0 : i32
    %c0_i32_1 = arith.constant 0 : i32
    return %c0_i32, %c0_i32_0 : i32, i32
  }
  func.func @transform_6(%arg0: i32) -> (i32, i32) {
    %c0_i32 = arith.constant 0 : i32
    %c0_i32_0 = arith.constant 0 : i32
    %c0_i32_1 = arith.constant 0 : i32
    return %c0_i32, %c0_i32_0 : i32, i32
  }
  func.func @transform_7(%arg0: i32) -> (i32, i32) {
    %c0_i32 = arith.constant 0 : i32
    %c0_i32_0 = arith.constant 0 : i32
    return %arg0, %c0_i32 : i32, i32
  }
}

</mosaic_0001>

<bundles_post_ra>
// kernel: tpu_custom_call.1
= control target key start
LH: loop header
LB: loop body
LE: loop exit
PB: predicated region body
PF: predicated region fallthrough
CT: control target
= control target key end

     0   :  { %12 = vsyncpa [#allocation3], 0  ;;  %s1356_s0 = inlined_call_operand.hbm [shape: f32[8,128], index: 0, kind: input, shape index: {}]   ;;  %s1357_s1 = inlined_call_operand.hbm [shape: bf16[128,128], index: 1, kind: input, shape index: {}]   ;;  %s1358_s2 = inlined_call_operand.vmem [shape: f32[1,128], index: 2, kind: input, shape index: {}]   ;;  %s1359_s3 = inlined_call_operand.hbm [shape: bf16[128,512], index: 3, kind: input, shape index: {}]   ;;  %s1360_s4 = inlined_call_operand.vmem [shape: f32[1,512], index: 4, kind: input, shape index: {}]   ;;  %s1361_s5 = inlined_call_operand.hbm [shape: bf16[512,128], index: 5, kind: input, shape index: {}]   ;;  %s1362_s6 = inlined_call_operand.vmem [shape: f32[1,128], index: 6, kind: input, shape index: {}]   ;;  %s1363_s7 = inlined_call_operand.hbm [shape: f32[8,256], index: 7, kind: output, shape index: {}]  }
   0x1   :  { %13 = vsyncpa [#allocation6], 0 }
   0x2   :  { %14 = vsyncpa [#allocation9], 0 }
   0x3   :  { %15 = vsyncpa [#allocation4], 0  ;;  %s1229_s24 = smov [#allocation5]   ;;  %s1111_s28 = scalar_lea.hbm %s1357_s1, 1024 }
   0x4   :  { %s31_s25 = sshll.u32 %s1229_s24, 4  ;;  %p1112_p0 = scmp.ne.s32.totalorder %s1357_s1, %s1111_s28  ;;  %s32_s25 = int_to_ptr.vmem [resolvable:$true] %s31_s25 }
   0x5   :  { %p1115_p1 = scmp.lt.u32.totalorder %s1111_s28, %s1357_s1 }
   0x7   :  { %p1117_p2 = pnand %p1115_p1, %p1112_p0 }
   0x9   :  { %1120 = shalt.err (!%p1117_p2)
}
   0xa   :  { %s1121_s10 = scalar_lea.vmem %s32_s25, 1024  ;;  %p1126_p4 = scmp.lt.s32.totalorder %s32_s25, %s32_s25 }
   0xb   :  { %p1122_p3 = scmp.ne.s32.totalorder %s32_s25, %s1121_s10  ;;  %p1127_p5 = scmp.lt.s32.totalorder %s1121_s10, %s1121_s10 }
   0xd   :  { %p1128_p6 = por %p1127_p5, %p1126_p4 }
   0xf   :  { %p1129_p7 = pnand %p1128_p6, %p1122_p3 }
  0x11   :  { %1132 = shalt.err (!%p1129_p7)
}
  0x12   :  { %s1230_s11 = smov 64   ;;  %s1231_s12 = smov 4  }
  0x13   :  { %37 = dma.hbm_to_vmem [thread:$0]  %s1357_s1, 1024, %s32_s25, [#allocation6], %s1230_s11, %s1230_s11, %s1231_s12  }
  0x14   :  { %s1232_s15 = smov [#allocation2]   ;;  %s1233_s17 = smov [#allocation7]  }
  0x15   :  { %s22_s16 = sshll.u32 %s1232_s15, 4  ;;  %s45_s18 = sshll.u32 %s1233_s17, 4  ;;  %s23_s16 = int_to_ptr.vmem [resolvable:$true] %s22_s16  ;;  %s46_s18 = int_to_ptr.vmem [resolvable:$true] %s45_s18 }
  0x16   :  { %s1133_s21 = scalar_lea.hbm %s1356_s0, 128 }
  0x17   :  { %p1134_p8 = scmp.ne.s32.totalorder %s1356_s0, %s1133_s21  ;;  %p1137_p9 = scmp.lt.u32.totalorder %s1133_s21, %s1356_s0 }
  0x19   :  { %p1139_p10 = pnand %p1137_p9, %p1134_p8 }
  0x1b   :  { %1142 = shalt.err (!%p1139_p10)
}
  0x1c   :  { %s1143_s1 = scalar_lea.vmem %s23_s16, 128  ;;  %p1148_p12 = scmp.lt.s32.totalorder %s23_s16, %s23_s16 }
  0x1d   :  { %p1144_p11 = scmp.ne.s32.totalorder %s23_s16, %s1143_s1  ;;  %p1149_p13 = scmp.lt.s32.totalorder %s1143_s1, %s1143_s1 }
  0x1f   :  { %p1150_p0 = por %p1149_p13, %p1148_p12 }
  0x21   :  { %p1151_p1 = pnand %p1150_p0, %p1144_p11 }
  0x23   :  { %1154 = shalt.err (!%p1151_p1)
}
  0x24   :  { %25 = dma.hbm_to_vmem [thread:$0]  %s1356_s0, 128, %s23_s16, [#allocation3]  }
  0x25   :  { %s1155_s30 = scalar_lea.hbm %s1359_s3, 4096 }
  0x26   :  { %p1156_p2 = scmp.ne.s32.totalorder %s1359_s3, %s1155_s30  ;;  %p1159_p3 = scmp.lt.u32.totalorder %s1155_s30, %s1359_s3 }
  0x28   :  { %p1161_p4 = pnand %p1159_p3, %p1156_p2 }
  0x2a   :  { %1164 = shalt.err (!%p1161_p4)
}
  0x2b   :  { %s1165_s14 = scalar_lea.vmem %s46_s18, 4096  ;;  %p1170_p6 = scmp.lt.s32.totalorder %s46_s18, %s46_s18 }
  0x2c   :  { %p1166_p5 = scmp.ne.s32.totalorder %s46_s18, %s1165_s14  ;;  %p1171_p7 = scmp.lt.s32.totalorder %s1165_s14, %s1165_s14 }
  0x2e   :  { %p1172_p8 = por %p1171_p7, %p1170_p6 }
  0x30   :  { %p1173_p9 = pnand %p1172_p8, %p1166_p5 }
  0x32   :  { %1176 = shalt.err (!%p1173_p9)
}
  0x33   :  { %s1234_s0 = smov 256   ;;  %s1235_s15 = smov 16  }
  0x34   :  { %51 = dma.hbm_to_vmem [thread:$0]  %s1359_s3, 4096, %s46_s18, [#allocation6], %s1234_s0, %s1234_s0, %s1235_s15  }
  0x35   :  { %s1236_s19 = smov [#allocation8]   ;;  %s1177_s23 = scalar_lea.hbm %s1361_s5, 4096 }
  0x36   :  { %s59_s20 = sshll.u32 %s1236_s19, 4  ;;  %p1178_p10 = scmp.ne.s32.totalorder %s1361_s5, %s1177_s23  ;;  %s60_s20 = int_to_ptr.vmem [resolvable:$true] %s59_s20 }
  0x37   :  { %p1181_p11 = scmp.lt.u32.totalorder %s1177_s23, %s1361_s5 }
  0x39   :  { %p1183_p12 = pnand %p1181_p11, %p1178_p10 }
  0x3b   :  { %1186 = shalt.err (!%p1183_p12)
}
  0x3c   :  { %s1187_s27 = scalar_lea.vmem %s60_s20, 4096  ;;  %p1192_p0 = scmp.lt.s32.totalorder %s60_s20, %s60_s20 }
  0x3d   :  { %p1188_p13 = scmp.ne.s32.totalorder %s60_s20, %s1187_s27  ;;  %p1193_p1 = scmp.lt.s32.totalorder %s1187_s27, %s1187_s27 }
  0x3f   :  { %p1194_p2 = por %p1193_p1, %p1192_p0 }
  0x41   :  { %p1195_p3 = pnand %p1194_p2, %p1188_p13 }
  0x43   :  { %1198 = shalt.err (!%p1195_p3)
}
  0x44   :  { %65 = dma.hbm_to_vmem [thread:$0]  %s1361_s5, 4096, %s60_s20, [#allocation9], %s1230_s11, %s1230_s11, %s1231_s12  }
  0x45   :  { %1221 = dma.done.wait [#allocation3], 128  }
  0x46   :  { %1222 = vsyncadd [#allocation3], 4294967168 }
  0x47   :  { %1223 = dma.done.wait [#allocation6], 5120  }
  0x48   :  { %1224 = vsyncadd [#allocation6], 4294962176 }
  0x49   :  { %1225 = dma.done.wait [#allocation9], 4096  }
  0x4a   :  { %1226 = vsyncadd [#allocation9], 4294963200  ;;  %v1237_v0 = vmov 0.0   ;;  %vm1238_vm0 = vmmov 0   ;;  %v1023_v1 = vld [vmem:[#allocation5] sm:$0xff]   ;;  %v1024_v2 = vld [vmem:[#allocation5 + $0x8] sm:$0xff]  }
  0x4b   :  { %991 = vmatprep.subr.bf16.mxu0 %v1237_v0  ;;  %1007 = vmatprep.mubr.msk.bf16.mxu0 %vm1238_vm0, %v1237_v0  ;;  %v1025_v3 = vld [vmem:[#allocation5 + $0x10] sm:$0xff]   ;;  %v1026_v5 = vld [vmem:[#allocation5 + $0x18] sm:$0xff]   ;;  %v1027_v8 = vld [vmem:[#allocation5 + $0x20] sm:$0xff]   ;;  %v1239_v43 = vmov 0   ;;  %s1240_s29 = smov [#allocation10]  }
  0x4c   :  { %992 = vmatpush3.bf16.msra.mxu0 %v1023_v1  ;;  %v1031_v4 = vld [vmem:[#allocation7 + $0x4] ss:$16 sps:$4 sm:$0xff]   ;;  %v1036_v6 = vld [vmem:[#allocation7] ss:$16 sps:$4 sm:$0xff]   ;;  %v1028_v13 = vld [vmem:[#allocation5 + $0x28] sm:$0xff]   ;;  %442 = vmatprep.mubr.bf16.mxu1 %v1239_v43  ;;  %s853_s30 = sshll.u32 %s1240_s29, 4  ;;  %s854_s30 = int_to_ptr.vmem [resolvable:$true] %s853_s30 }
  0x4d   :  { %993 = vmatprep.subr.bf16.mxu0 %v1237_v0  ;;  %410 = vmatprep.subr.bf16.mxu1 %v1031_v4  ;;  %v1037_v7 = vld [vmem:[#allocation7 + $0x24] ss:$16 sps:$4 sm:$0xff]   ;;  %v1042_v9 = vld [vmem:[#allocation7 + $0x20] ss:$16 sps:$4 sm:$0xff]   ;;  %v1030_v17 = vld [vmem:[#allocation5 + $0x38] sm:$0xff]   ;;  %s1199_s8 = scalar_lea.vmem %s854_s30, 256  ;;  %p1204_p5 = scmp.lt.s32.totalorder %s854_s30, %s854_s30 }
  0x4e   :  { %411 = vmatpush1.bf16.msra.mxu1 %v1036_v6  ;;  %v1043_v10 = vld [vmem:[#allocation7 + $0x44] ss:$16 sps:$4 sm:$0xff]   ;;  %v1048_v11 = vld [vmem:[#allocation7 + $0x40] ss:$16 sps:$4 sm:$0xff]   ;;  %v81_v20 = vld [vmem:[#allocation2] sm:$0xff]  ;;  %p1200_p4 = scmp.ne.s32.totalorder %s854_s30, %s1199_s8  ;;  %p1205_p6 = scmp.lt.s32.totalorder %s1199_s8, %s1199_s8 }
  0x4f   :  { %412 = vmatprep.subr.bf16.mxu1 %v1037_v7  ;;  %v1049_v12 = vld [vmem:[#allocation7 + $0x64] ss:$16 sps:$4 sm:$0xff]   ;;  %v1054_v14 = vld [vmem:[#allocation7 + $0x60] ss:$16 sps:$4 sm:$0xff]   ;;  %v1035_v21 = vld [vmem:[#allocation7 + $0xc] ss:$16 sps:$4 sm:$0xff]   ;;  %v82_v25 = vpack.c.bf16 %v81_v20, %v81_v20  ;;  %v230_v20 = vlaneseq }
  0x50   :  { %994 = vmatpush3.bf16.msra.mxu0 %v1024_v2  ;;  %v1055_v15 = vld [vmem:[#allocation7 + $0x84] ss:$16 sps:$4 sm:$0xff]   ;;  %v1060_v18 = vld [vmem:[#allocation7 + $0x80] ss:$16 sps:$4 sm:$0xff]   ;;  %v1033_v24 = vld [vmem:[#allocation7 + $0x8] ss:$16 sps:$4 sm:$0xff]   ;;  %p1206_p7 = por %p1205_p6, %p1204_p5 }
  0x51   :  { %995 = vmatprep.subr.bf16.mxu0 %v1237_v0  ;;  %v1029_v16 = vld [vmem:[#allocation5 + $0x30] sm:$0xff]   ;;  %v1041_v26 = vld [vmem:[#allocation7 + $0x2c] ss:$16 sps:$4 sm:$0xff]   ;;  %v1039_v27 = vld [vmem:[#allocation7 + $0x28] ss:$16 sps:$4 sm:$0xff]  }
  0x52   :  { %413 = vmatpush1.bf16.msra.mxu1 %v1042_v9  ;;  %v1061_v19 = vld [vmem:[#allocation7 + $0xa4] ss:$16 sps:$4 sm:$0xff]   ;;  %v1066_v22 = vld [vmem:[#allocation7 + $0xa0] ss:$16 sps:$4 sm:$0xff]   ;;  %v1047_v28 = vld [vmem:[#allocation7 + $0x4c] ss:$16 sps:$4 sm:$0xff]   ;;  %p1207_p8 = pnand %p1206_p7, %p1200_p4 }
  0x53   :  { %414 = vmatprep.subr.bf16.mxu1 %v1043_v10  ;;  %v1067_v23 = vld [vmem:[#allocation7 + $0xc4] ss:$16 sps:$4 sm:$0xff]   ;;  %v1045_v29 = vld [vmem:[#allocation7 + $0x48] ss:$16 sps:$4 sm:$0xff]   ;;  %v1053_v30 = vld [vmem:[#allocation7 + $0x6c] ss:$16 sps:$4 sm:$0xff]  }
  0x54   :  { %996 = vmatpush3.bf16.msra.mxu0 %v1025_v3  ;;  %v1051_v31 = vld [vmem:[#allocation7 + $0x68] ss:$16 sps:$4 sm:$0xff]   ;;  %v1059_v32 = vld [vmem:[#allocation7 + $0x8c] ss:$16 sps:$4 sm:$0xff]   ;;  %v1072_v38 = vld [vmem:[#allocation7 + $0xc0] ss:$16 sps:$4 sm:$0xff]  }
  0x55   :  { %997 = vmatprep.subr.bf16.mxu0 %v1237_v0  ;;  %v1057_v33 = vld [vmem:[#allocation7 + $0x88] ss:$16 sps:$4 sm:$0xff]   ;;  %v1065_v34 = vld [vmem:[#allocation7 + $0xac] ss:$16 sps:$4 sm:$0xff]   ;;  %v1073_v39 = vld [vmem:[#allocation7 + $0xe4] ss:$16 sps:$4 sm:$0xff]  }
  0x56   :  { %415 = vmatpush1.bf16.msra.mxu1 %v1048_v11  ;;  %v1063_v35 = vld [vmem:[#allocation7 + $0xa8] ss:$16 sps:$4 sm:$0xff]   ;;  %v1071_v36 = vld [vmem:[#allocation7 + $0xcc] ss:$16 sps:$4 sm:$0xff]   ;;  %v1078_v42 = vld [vmem:[#allocation7 + $0xe0] ss:$16 sps:$4 sm:$0xff]  }
  0x57   :  { %416 = vmatprep.subr.bf16.mxu1 %v1049_v12  ;;  %v1069_v37 = vld [vmem:[#allocation7 + $0xc8] ss:$16 sps:$4 sm:$0xff]   ;;  %v1077_v40 = vld [vmem:[#allocation7 + $0xec] ss:$16 sps:$4 sm:$0xff]   ;;  %v1079_v44 = vld [vmem:[#allocation8 + $0x40] sm:$0xff]  }
  0x58   :  { %998 = vmatpush3.bf16.msra.mxu0 %v1026_v5  ;;  %v1075_v41 = vld [vmem:[#allocation7 + $0xe8] ss:$16 sps:$4 sm:$0xff]   ;;  %v1080_v45 = vld [vmem:[#allocation8 + $0xc0] sm:$0xff]   ;;  %v1087_v60 = vld [vmem:[#allocation8 + $0x50] sm:$0xff]  }
  0x59   :  { %999 = vmatprep.subr.bf16.mxu0 %v1237_v0  ;;  %v864_v46 = vld [vmem:[%s1358_s2] ss:$0 sm:$0xff]  ;;  %v1081_v53 = vld [vmem:[#allocation8] sm:$0xff]   ;;  %v1083_v56 = vld [vmem:[#allocation8 + $0x48] sm:$0xff]  }
  0x5a   :  { %417 = vmatpush1.bf16.msra.mxu1 %v1054_v14  ;;  %v1082_v54 = vld [vmem:[#allocation8 + $0x80] sm:$0xff]   ;;  %v1084_v57 = vld [vmem:[#allocation8 + $0xc8] sm:$0xff]   ;;  %v1088_v61 = vld [vmem:[#allocation8 + $0xd0] sm:$0xff]  }
  0x5b   :  { %418 = vmatprep.subr.bf16.mxu1 %v1055_v15  ;;  %v1085_v58 = vld [vmem:[#allocation8 + $0x8] sm:$0xff]   ;;  %v1089_v62 = vld [vmem:[#allocation8 + $0x10] sm:$0xff]   ;;  %v1092_v1 = vld [vmem:[#allocation8 + $0xd8] sm:$0xff]  }
  0x5c   :  { %1000 = vmatpush3.bf16.msra.mxu0 %v1027_v8  ;;  %v1086_v59 = vld [vmem:[#allocation8 + $0x88] sm:$0xff]   ;;  %v1090_v63 = vld [vmem:[#allocation8 + $0x90] sm:$0xff]   ;;  %v1093_v2 = vld [vmem:[#allocation8 + $0x18] sm:$0xff]  }
  0x5d   :  { %1001 = vmatprep.subr.bf16.mxu0 %v1237_v0  ;;  %v1094_v3 = vld [vmem:[#allocation8 + $0x98] sm:$0xff]   ;;  %v1095_v4 = vld [vmem:[#allocation8 + $0x60] sm:$0xff]   ;;  %v1099_v8 = vld [vmem:[#allocation8 + $0x68] sm:$0xff]  }
  0x5e   :  { %419 = vmatpush1.bf16.msra.mxu1 %v1060_v18  ;;  %v1096_v5 = vld [vmem:[#allocation8 + $0xe0] sm:$0xff]   ;;  %v1100_v9 = vld [vmem:[#allocation8 + $0xe8] sm:$0xff]   ;;  %v1103_v12 = vld [vmem:[#allocation8 + $0x70] sm:$0xff]  }
  0x5f   :  { %420 = vmatprep.subr.bf16.mxu1 %v1061_v19  ;;  %v1097_v6 = vld [vmem:[#allocation8 + $0x20] sm:$0xff]   ;;  %v1101_v10 = vld [vmem:[#allocation8 + $0x28] sm:$0xff]   ;;  %v1105_v14 = vld [vmem:[#allocation8 + $0x30] sm:$0xff]  }
  0x60   :  { %1002 = vmatpush3.bf16.msra.mxu0 %v1028_v13  ;;  %v1098_v7 = vld [vmem:[#allocation8 + $0xa0] sm:$0xff]   ;;  %v1102_v11 = vld [vmem:[#allocation8 + $0xa8] sm:$0xff]   ;;  %v1104_v13 = vld [vmem:[#allocation8 + $0xf0] sm:$0xff]  }
  0x61   :  { %1003 = vmatprep.subr.bf16.mxu0 %v1237_v0  ;;  %v1106_v15 = vld [vmem:[#allocation8 + $0xb0] sm:$0xff]   ;;  %v1109_v18 = vld [vmem:[#allocation8 + $0x38] sm:$0xff]  }
  0x62   :  { %421 = vmatpush1.bf16.msra.mxu1 %v1066_v22  ;;  %v1110_v19 = vld [vmem:[#allocation8 + $0xb8] sm:$0xff]  }
  0x63   :  { %422 = vmatprep.subr.bf16.mxu1 %v1067_v23 }
  0x64   :  { %1004 = vmatpush3.bf16.msra.mxu0 %v1029_v16  ;;  %v1107_v16 = vld [vmem:[#allocation8 + $0x78] sm:$0xff]  }
  0x65   :  { %1005 = vmatprep.subr.bf16.mxu0 %v1237_v0  ;;  %v1091_v0 = vld [vmem:[#allocation8 + $0x58] sm:$0xff]  }
  0x66   :  { %423 = vmatpush1.bf16.msra.mxu1 %v1072_v38 }
  0x67   :  { %424 = vmatprep.subr.bf16.mxu1 %v1073_v39 }
  0x68   :  { %1006 = vmatpush3.bf16.msra.mxu0 %v1030_v17  ;;  %v1108_v17 = vld [vmem:[#allocation8 + $0xf8] sm:$0xff]  }
  0x69   :  { %451 = vmatprep.subr.bf16.mxu0 %v1035_v21  ;;  %v231_v21 = vshrl.u32 %v230_v20, 7 }
  0x6a   :  { %425 = vmatpush1.bf16.msra.mxu1 %v1078_v42 }
  0x6b   :  { %1008 = vmatmul.mubr.bf16.vlgmr.msra.gmra.mrb[0].mxu0 %v82_v25  ;;  %947 = vmatprep.subr.bf16.mxu1 %v1079_v44  ;;  %v232_v22 = vsub.s32 0, %v231_v21  ;;  %v240_v23 = vsub.s32 2, %v231_v21  ;;  %v236_v25 = vsub.s32 1, %v231_v21 }
  0x6c   :  { %452 = vmatpush1.bf16.msra.mxu0 %v1033_v24  ;;  %483 = vmatprep.mubr.bf16.mxu0 %v1239_v43  ;;  %v228_v24 = vld [vmem:[%s1360_s4] sm:$0xf] }
  0x6d   :  { %453 = vmatprep.subr.bf16.mxu0 %v1041_v26  ;;  %v244_v26 = vsub.s32 3, %v231_v21 }
  0x70   :  { %454 = vmatpush1.bf16.msra.mxu0 %v1039_v27  ;;  %v233_v27 = vrot.slane %v228_v24, %v232_v22 }
  0x71   :  { %455 = vmatprep.subr.bf16.mxu0 %v1047_v28  ;;  %v241_v28 = vrot.slane %v228_v24, %v240_v23 }
  0x74   :  { %456 = vmatpush1.bf16.msra.mxu0 %v1045_v29  ;;  %v237_v29 = vrot.slane %v228_v24, %v236_v25 }
  0x75   :  { %457 = vmatprep.subr.bf16.mxu0 %v1053_v30  ;;  %v245_v30 = vrot.slane %v228_v24, %v244_v26 }
  0x78   :  { %458 = vmatpush1.bf16.msra.mxu0 %v1051_v31 }
  0x79   :  { %459 = vmatprep.subr.bf16.mxu0 %v1059_v32 }
  0x7c   :  { %460 = vmatpush1.bf16.msra.mxu0 %v1057_v33 }
  0x7d   :  { %461 = vmatprep.subr.bf16.mxu0 %v1065_v34 }
  0x80   :  { %462 = vmatpush1.bf16.msra.mxu0 %v1063_v35 }
  0x81   :  { %463 = vmatprep.subr.bf16.mxu0 %v1071_v36 }
  0x84   :  { %464 = vmatpush1.bf16.msra.mxu0 %v1069_v37 }
  0x85   :  { %465 = vmatprep.subr.bf16.mxu0 %v1077_v40 }
  0x88   :  { %466 = vmatpush1.bf16.msra.mxu0 %v1075_v41 }
  0x89   :  { %969 = vmatprep.subr.bf16.mxu0 %v1080_v45 }
 0x13e   :  { %v188_v47 = vpop.f32.mrb[0].mxu0 }
 0x13f   :  { %v189_v48 = vadd.f32 %v864_v46, %v188_v47  ;;  %v1009_v49 = vpop.f32.mrb[1].mxu0 }
 0x140   :  { %v191_v50 = vpop.f32.mrb[2].mxu0 }
 0x141   :  { %v194_v51 = vmax.f32 %v189_v48, 0.0  ;;  %v1010_v52 = vpop.f32.mrb[3].mxu0 }
 0x143   :  { %v195_v55 = vpack.c.bf16 %v194_v51, %v194_v51 }
 0x145   :  { %443 = vmatmul.mubr.bf16.vlgmr.msra.gmra.mrb[0].mxu1 %v195_v55  ;;  %484 = vmatmul.mubr.bf16.vlgmr.msra.gmra.mrb[4].mxu0 %v195_v55 }
 0x146   :  { %948 = vmatpush3.bf16.msra.mxu1 %v1081_v53  ;;  %970 = vmatpush3.bf16.msra.mxu0 %v1082_v54  ;;  %v905_v53 = vld [vmem:[%s1362_s6] ss:$0 sm:$0xff] }
 0x147   :  { %949 = vmatprep.subr.bf16.mxu1 %v1083_v56  ;;  %971 = vmatprep.subr.bf16.mxu0 %v1084_v57 }
 0x14a   :  { %950 = vmatpush3.bf16.msra.mxu1 %v1085_v58  ;;  %972 = vmatpush3.bf16.msra.mxu0 %v1086_v59 }
 0x14b   :  { %951 = vmatprep.subr.bf16.mxu1 %v1087_v60  ;;  %973 = vmatprep.subr.bf16.mxu0 %v1088_v61 }
 0x14e   :  { %952 = vmatpush3.bf16.msra.mxu1 %v1089_v62  ;;  %974 = vmatpush3.bf16.msra.mxu0 %v1090_v63 }
 0x14f   :  { %953 = vmatprep.subr.bf16.mxu1 %v1091_v0  ;;  %975 = vmatprep.subr.bf16.mxu0 %v1092_v1 }
 0x152   :  { %954 = vmatpush3.bf16.msra.mxu1 %v1093_v2  ;;  %976 = vmatpush3.bf16.msra.mxu0 %v1094_v3 }
 0x153   :  { %955 = vmatprep.subr.bf16.mxu1 %v1095_v4  ;;  %977 = vmatprep.subr.bf16.mxu0 %v1096_v5 }
 0x156   :  { %956 = vmatpush3.bf16.msra.mxu1 %v1097_v6  ;;  %978 = vmatpush3.bf16.msra.mxu0 %v1098_v7 }
 0x157   :  { %957 = vmatprep.subr.bf16.mxu1 %v1099_v8  ;;  %979 = vmatprep.subr.bf16.mxu0 %v1100_v9 }
 0x15a   :  { %958 = vmatpush3.bf16.msra.mxu1 %v1101_v10  ;;  %980 = vmatpush3.bf16.msra.mxu0 %v1102_v11 }
 0x15b   :  { %959 = vmatprep.subr.bf16.mxu1 %v1103_v12  ;;  %981 = vmatprep.subr.bf16.mxu0 %v1104_v13 }
 0x15e   :  { %960 = vmatpush3.bf16.msra.mxu1 %v1105_v14  ;;  %982 = vmatpush3.bf16.msra.mxu0 %v1106_v15 }
 0x15f   :  { %961 = vmatprep.subr.bf16.mxu1 %v1107_v16  ;;  %983 = vmatprep.subr.bf16.mxu0 %v1108_v17 }
 0x162   :  { %962 = vmatpush3.bf16.msra.mxu1 %v1109_v18  ;;  %984 = vmatpush3.bf16.msra.mxu0 %v1110_v19 }
 0x218   :  { %v444_v31 = vpop.f32.mrb[0].mxu1  ;;  %v485_v32 = vpop.f32.mrb[4].mxu0 }
 0x219   :  { %v445_v33 = vadd.f32 %v444_v31, %v233_v27  ;;  %v486_v34 = vadd.f32 %v485_v32, %v241_v28  ;;  %v446_v35 = vpop.f32.mrb[1].mxu1  ;;  %v487_v36 = vpop.f32.mrb[5].mxu0 }
 0x21a   :  { %v447_v37 = vadd.f32 %v446_v35, %v237_v29  ;;  %v488_v38 = vadd.f32 %v487_v36, %v245_v30  ;;  %v448_v39 = vpop.f32.mrb[2].mxu1  ;;  %v489_v40 = vpop.f32.mrb[6].mxu0 }
 0x21b   :  { %v492_v41 = vmax.f32 %v445_v33, 0.0  ;;  %v494_v42 = vmax.f32 %v486_v34, 0.0  ;;  %v449_v43 = vpop.f32.mrb[3].mxu1  ;;  %v490_v44 = vpop.f32.mrb[7].mxu0 }
 0x21c   :  { %v493_v45 = vmax.f32 %v447_v37, 0.0  ;;  %v495_v46 = vmax.f32 %v488_v38, 0.0 }
 0x21d   :  { %v496_v49 = vpack.c.bf16 %v492_v41, %v492_v41  ;;  %v498_v50 = vpack.c.bf16 %v494_v42, %v494_v42 }
 0x21e   :  { %v497_v47 = vpack.c.bf16 %v493_v45, %v493_v45  ;;  %v499_v48 = vpack.c.bf16 %v495_v46, %v495_v46 }
 0x220   :  { %795 = vmatprep.mubr.bf16.mxu1 %v497_v47  ;;  %835 = vmatprep.mubr.bf16.mxu0 %v499_v48 }
 0x221   :  { %796 = vmatmul.mubr.bf16.vlgmr.msra.gmra.mrb[4].mxu1 %v496_v49  ;;  %836 = vmatmul.mubr.bf16.vlgmr.msra.gmra.mrb[8].mxu0 %v498_v50 }
 0x2f4   :  { %v963_v51 = vpop.f32.mrb[4].mxu1  ;;  %v985_v52 = vpop.f32.mrb[8].mxu0 }
 0x2f5   :  { %v964_v54 = vpop.f32.mrb[5].mxu1  ;;  %v986_v55 = vpop.f32.mrb[9].mxu0 }
 0x2f6   :  { %v965_v56 = vadd.f32 %v964_v54, %v963_v51  ;;  %v987_v57 = vadd.f32 %v986_v55, %v985_v52  ;;  %v966_v58 = vpop.f32.mrb[6].mxu1  ;;  %v988_v59 = vpop.f32.mrb[10].mxu0 }
 0x2f7   :  { %v967_v60 = vpop.f32.mrb[7].mxu1  ;;  %v989_v61 = vpop.f32.mrb[11].mxu0 }
 0x2f8   :  { %v798_v62 = vadd.f32 %v965_v56, %v905_v53 }
 0x2fa   :  { %v838_v63 = vadd.f32 %v987_v57, %v798_v62 }
 0x2fc   :  { %v844_v0 = vmax.f32 %v838_v63, -20.0  ;;  %843 = vst [vmem:[#allocation10] sm:$0xff] %v838_v63 }
 0x2fe   :  { %v845_v1 = vmin.f32 %v844_v0, 2.0 }
 0x300   :  { %846 = vst [vmem:[#allocation10 + $0x8] sm:$0xff] %v845_v1 }
 0x301   :  { %1210 = shalt.err (!%p1207_p8)
}
 0x302   :  { %s1211_s10 = scalar_lea.hbm %s1363_s7, 256 }
 0x303   :  { %p1212_p9 = scmp.ne.s32.totalorder %s1363_s7, %s1211_s10  ;;  %p1215_p10 = scmp.lt.u32.totalorder %s1211_s10, %s1363_s7 }
 0x305   :  { %p1217_p11 = pnand %p1215_p10, %p1212_p9 }
 0x307   :  { %1220 = shalt.err (!%p1217_p11)
}
 0x308   :  { %856 = dma.vmem_to_hbm [thread:$0]  %s854_s30, 256, %s1363_s7, [#allocation4]  }
 0x309   :  { %1227 = dma.done.wait [#allocation4], 256  }
 0x30a   :  { %1228 = vsyncadd [#allocation4], 4294967040 }
 0x30b   :  { %860 = vsyncpa [#allocation3], 1 }
 0x30c   :  { %861 = vsyncpa [#allocation6], 1 }
 0x30d   :  { %862 = vsyncpa [#allocation9], 1 }
 0x30e   :  { %863 = vsyncpa [#allocation4], 1 }

</bundles_post_ra>
